<compile_context>
chip_gen: v7x
topology: tpu7x:2x2x1
jax: 0.10.0
libtpu: 0.0.40
codegen_flags: <defaults>
</compile_context>

<pallas_src>
import jax
import jax.numpy as jnp
from jax.experimental import pallas as pl
from jax.experimental.pallas import tpu as pltpu


def _backproj_kernel(y_ref, w_ref, o_ref, yexp_ref):
    """One grid step handles a single (batch, d1) slab.

    y_ref    : (1, K, 1, n2, n3)        native coded-signal tile
    w_ref    : (b1, b2, K, D3)          filter taps pre-tiled along the
                                        interleaved lane axis (D3 = n3*b3)
    o_ref    : (1, 1, b1, n2, b2, D3)   output tile, already in final layout
    yexp_ref : (K, n2, D3)              VMEM scratch: lane-expanded y
    """
    _, K, _, n2, n3 = y_ref.shape
    b1, b2, _, D3 = w_ref.shape
    b3 = D3 // n3

    # ---- Stage 1: build the d3/i3 lane interleave of y, once per channel ----
    #   yexp[k, d2, d3*b3 + i3] = y[k, d2, d3]
    for k in range(K):
        yk = y_ref[0, k, 0, :, :]                               # (n2, n3)
        if b3 == 1:
            yexp_ref[k, :, :] = yk
        else:
            for d3 in range(n3):
                yexp_ref[k, :, d3 * b3:(d3 + 1) * b3] = jnp.broadcast_to(
                    yk[:, d3:d3 + 1], (n2, b3))

    # ---- Stage 2: contract over K on the VPU at full lane width ------------
    w = w_ref[...]                                              # (b1, b2, K, D3)
    ye = [yexp_ref[k, :, :] for k in range(K)]                  # K x (n2, D3)
    for i1 in range(b1):
        for i2 in range(b2):
            acc = ye[0] * w[i1, i2, 0:1, :]
            for k in range(1, K):
                acc = acc + ye[k] * w[i1, i2, k:k + 1, :]
            # Store straight into the final interleaved position
            # (row-slab i2 of the (d2, i2) sublane interleave).
            o_ref[0, 0, i1, :, i2, :] = acc


def _backproj_pallas(y, wrep):
    """y: (B, K, n1, n2, n3) f32, wrep: (b1, b2, K, D3) f32
    -> Z: (B, n1, b1, n2, b2, D3) f32 (memory order == final output layout)."""
    B, K, n1, n2, n3 = y.shape
    b1, b2, _, D3 = wrep.shape

    return pl.pallas_call(
        _backproj_kernel,
        out_shape=jax.ShapeDtypeStruct((B, n1, b1, n2, b2, D3), jnp.float32),
        grid_spec=pltpu.PrefetchScalarGridSpec(
            num_scalar_prefetch=0,
            grid=(B, n1),
            in_specs=[
                # y in native layout: one (K, n2, n3) slab per (b, d1).
                pl.BlockSpec((1, K, 1, n2, n3), lambda b, d1: (b, 0, d1, 0, 0)),
                # Tiny filter table: resident across all grid steps.
                pl.BlockSpec((b1, b2, K, D3), lambda b, d1: (0, 0, 0, 0)),
            ],
            # One contiguous slab of the final output per step.
            out_specs=pl.BlockSpec((1, 1, b1, n2, b2, D3),
                                   lambda b, d1: (b, d1, 0, 0, 0, 0)),
            scratch_shapes=[pltpu.VMEM((K, n2, D3), jnp.float32)],
        ),
        compiler_params=pltpu.CompilerParams(
            dimension_semantics=("parallel", "parallel")),
    )(y, wrep)


def unfilt_backproj_3d(y, W):
    """JAX/Pallas equivalent of UnfiltBackproj3DForLoop.forward.

    y: (B, K, n1, n2, n3) or (K, n1, n2, n3)
    W: (K, 1, b1, b2, b3)
    returns: (B, 1, b1*n1, b2*n2, b3*n3) float32
    """
    assert y.ndim in (4, 5), "Invalid input y dims"
    assert W.ndim == 5, "Invalid input W dims"
    if y.ndim == 4:
        y = y[None]
    assert y.shape[1] == W.shape[0], (
        "Number of filters in W should match number of channels of y")

    B, K, n1, n2, n3 = y.shape
    _, _, b1, b2, b3 = W.shape
    D3 = n3 * b3

    y32 = y.astype(jnp.float32)

    # Host-side prep touches only the tiny filter tensor:
    #   wrep[i1, i2, k, d3*b3 + i3] = W[k, 0, i1, i2, i3]
    wrep = jnp.tile(
        jnp.transpose(W[:, 0].astype(jnp.float32), (1, 2, 0, 3)),
        (1, 1, 1, n3))                                          # (b1, b2, K, D3)

    z = _backproj_pallas(y32, wrep)                             # (B, n1, b1, n2, b2, D3)

    # Memory-order-preserving (free) reshape to the module's output layout.
    return z.reshape(B, 1, n1 * b1, n2 * b2, D3)


def _reference(y, W):
    """Pure-JAX reference (elementwise broadcast + sum, exact f32)."""
    if y.ndim == 4:
        y = y[None]
    y = y.astype(jnp.float32)
    W0 = W[:, 0].astype(jnp.float32)                            # (K, b1, b2, b3)
    prod = (y[:, :, :, None, :, None, :, None] *
            W0[None, :, None, :, None, :, None, :])             # (B,K,n1,b1,n2,b2,n3,b3)
    out = prod.sum(axis=1)                                      # (B,n1,b1,n2,b2,n3,b3)
    B, n1, b1, n2, b2, n3, b3 = out.shape
    return out.reshape(B, 1, n1 * b1, n2 * b2, n3 * b3)


if __name__ == "__main__":
    key = jax.random.PRNGKey(0)
    k1, k2 = jax.random.split(key)

    # Small shapes: batch=2, K=4 coded channels, coded signal 4^3, filters 2^3.
    B, K = 2, 4
    n1, n2, n3 = 4, 4, 4
    b1, b2, b3 = 2, 2, 2

    y = jax.random.normal(k1, (B, K, n1, n2, n3), dtype=jnp.float32)
    W = jax.random.normal(k2, (K, 1, b1, b2, b3), dtype=jnp.float32)

    fwd = jax.jit(unfilt_backproj_3d)
    xhat = jax.block_until_ready(fwd(y, W))

    ref = _reference(y, W)
    assert xhat.shape == (B, 1, b1 * n1, b2 * n2, b3 * n3)
    assert jnp.allclose(xhat, ref, atol=1e-5, rtol=1e-5), float(
        jnp.max(jnp.abs(xhat - ref)))

    print("KERNEL_OK")
</pallas_src>

<mosaic_0001>
module attributes {stable_mosaic.version = 11 : i64} {
  func.func @_backproj_kernel(%arg0: i32, %arg1: i32, %arg2: memref<1x4x1x4x4xf32, #tpu.memory_space<vmem>>, %arg3: memref<2x2x4x8xf32, #tpu.memory_space<vmem>>, %arg4: memref<1x1x2x4x2x8xf32, #tpu.memory_space<vmem>>, %arg5: memref<4x4x8xf32, #tpu.memory_space<vmem>>) attributes {dimension_semantics = [#tpu.dimension_semantics<parallel>, #tpu.dimension_semantics<parallel>], iteration_bounds = array<i64: 2, 4>, scalar_prefetch = 0 : i64, scratch_operands = 1 : i64, tpu.core_type = #tpu.core_type<tc>, window_params = [{transform_indices = @transform_0, window_bounds = array<i64: 1, 4, 1, 4, 4>}, {pipeline_mode = #tpu.pipeline_mode<synchronous>, transform_indices = @transform_1, window_bounds = array<i64: 2, 2, 4, 8>}, {transform_indices = @transform_2, window_bounds = array<i64: 1, 1, 2, 4, 2, 8>}]} {
    %c0 = arith.constant 0 : index
    %c0_0 = arith.constant 0 : index
    %c0_1 = arith.constant 0 : index
    %c0_2 = arith.constant 0 : index
    %c0_3 = arith.constant 0 : index
    %0 = vector.load %arg2[%c0, %c0_0, %c0_1, %c0_2, %c0_3] : memref<1x4x1x4x4xf32, #tpu.memory_space<vmem>>, vector<1x1x1x4x4xf32>
    %1 = vector.shape_cast %0 : vector<1x1x1x4x4xf32> to vector<4x4xf32>
    %2 = vector.extract_strided_slice %1 {offsets = [0, 0], sizes = [4, 1], strides = [1, 1]} : vector<4x4xf32> to vector<4x1xf32>
    %3 = vector.shape_cast %2 : vector<4x1xf32> to vector<4x1xf32>
    %4 = vector.broadcast %3 : vector<4x1xf32> to vector<4x2xf32>
    %c0_4 = arith.constant 0 : index
    %c0_5 = arith.constant 0 : index
    %c0_6 = arith.constant 0 : index
    %5 = vector.load %arg5[%c0_4, %c0_5, %c0_6] : memref<4x4x8xf32, #tpu.memory_space<vmem>>, vector<1x4x2xf32>
    %6 = vector.shape_cast %5 : vector<1x4x2xf32> to vector<4x2xf32>
    %7 = vector.shape_cast %4 : vector<4x2xf32> to vector<1x4x2xf32>
    tpu.vector_store %arg5[%c0_4, %c0_5, %c0_6], %7 {strides = array<i32>} : memref<4x4x8xf32, #tpu.memory_space<vmem>>, vector<1x4x2xf32>,
    %8 = vector.extract_strided_slice %1 {offsets = [0, 1], sizes = [4, 1], strides = [1, 1]} : vector<4x4xf32> to vector<4x1xf32>
    %9 = vector.shape_cast %8 : vector<4x1xf32> to vector<4x1xf32>
    %10 = vector.broadcast %9 : vector<4x1xf32> to vector<4x2xf32>
    %c0_7 = arith.constant 0 : index
    %c0_8 = arith.constant 0 : index
    %c2 = arith.constant 2 : index
    %11 = vector.load %arg5[%c0_7, %c0_8, %c2] : memref<4x4x8xf32, #tpu.memory_space<vmem>>, vector<1x4x2xf32>
    %12 = vector.shape_cast %11 : vector<1x4x2xf32> to vector<4x2xf32>
    %13 = vector.shape_cast %10 : vector<4x2xf32> to vector<1x4x2xf32>
    tpu.vector_store %arg5[%c0_7, %c0_8, %c2], %13 {strides = array<i32>} : memref<4x4x8xf32, #tpu.memory_space<vmem>>, vector<1x4x2xf32>,
    %14 = vector.extract_strided_slice %1 {offsets = [0, 2], sizes = [4, 1], strides = [1, 1]} : vector<4x4xf32> to vector<4x1xf32>
    %15 = vector.shape_cast %14 : vector<4x1xf32> to vector<4x1xf32>
    %16 = vector.broadcast %15 : vector<4x1xf32> to vector<4x2xf32>
    %c0_9 = arith.constant 0 : index
    %c0_10 = arith.constant 0 : index
    %c4 = arith.constant 4 : index
    %17 = vector.load %arg5[%c0_9, %c0_10, %c4] : memref<4x4x8xf32, #tpu.memory_space<vmem>>, vector<1x4x2xf32>
    %18 = vector.shape_cast %17 : vector<1x4x2xf32> to vector<4x2xf32>
    %19 = vector.shape_cast %16 : vector<4x2xf32> to vector<1x4x2xf32>
    tpu.vector_store %arg5[%c0_9, %c0_10, %c4], %19 {strides = array<i32>} : memref<4x4x8xf32, #tpu.memory_space<vmem>>, vector<1x4x2xf32>,
    %20 = vector.extract_strided_slice %1 {offsets = [0, 3], sizes = [4, 1], strides = [1, 1]} : vector<4x4xf32> to vector<4x1xf32>
    %21 = vector.shape_cast %20 : vector<4x1xf32> to vector<4x1xf32>
    %22 = vector.broadcast %21 : vector<4x1xf32> to vector<4x2xf32>
    %c0_11 = arith.constant 0 : index
    %c0_12 = arith.constant 0 : index
    %c6 = arith.constant 6 : index
    %23 = vector.load %arg5[%c0_11, %c0_12, %c6] : memref<4x4x8xf32, #tpu.memory_space<vmem>>, vector<1x4x2xf32>
    %24 = vector.shape_cast %23 : vector<1x4x2xf32> to vector<4x2xf32>
    %25 = vector.shape_cast %22 : vector<4x2xf32> to vector<1x4x2xf32>
    tpu.vector_store %arg5[%c0_11, %c0_12, %c6], %25 {strides = array<i32>} : memref<4x4x8xf32, #tpu.memory_space<vmem>>, vector<1x4x2xf32>,
    %c0_13 = arith.constant 0 : index
    %c1 = arith.constant 1 : index
    %c0_14 = arith.constant 0 : index
    %c0_15 = arith.constant 0 : index
    %c0_16 = arith.constant 0 : index
    %26 = vector.load %arg2[%c0_13, %c1, %c0_14, %c0_15, %c0_16] : memref<1x4x1x4x4xf32, #tpu.memory_space<vmem>>, vector<1x1x1x4x4xf32>
    %27 = vector.shape_cast %26 : vector<1x1x1x4x4xf32> to vector<4x4xf32>
    %28 = vector.extract_strided_slice %27 {offsets = [0, 0], sizes = [4, 1], strides = [1, 1]} : vector<4x4xf32> to vector<4x1xf32>
    %29 = vector.shape_cast %28 : vector<4x1xf32> to vector<4x1xf32>
    %30 = vector.broadcast %29 : vector<4x1xf32> to vector<4x2xf32>
    %c1_17 = arith.constant 1 : index
    %c0_18 = arith.constant 0 : index
    %c0_19 = arith.constant 0 : index
    %31 = vector.load %arg5[%c1_17, %c0_18, %c0_19] : memref<4x4x8xf32, #tpu.memory_space<vmem>>, vector<1x4x2xf32>
    %32 = vector.shape_cast %31 : vector<1x4x2xf32> to vector<4x2xf32>
    %33 = vector.shape_cast %30 : vector<4x2xf32> to vector<1x4x2xf32>
    tpu.vector_store %arg5[%c1_17, %c0_18, %c0_19], %33 {strides = array<i32>} : memref<4x4x8xf32, #tpu.memory_space<vmem>>, vector<1x4x2xf32>,
    %34 = vector.extract_strided_slice %27 {offsets = [0, 1], sizes = [4, 1], strides = [1, 1]} : vector<4x4xf32> to vector<4x1xf32>
    %35 = vector.shape_cast %34 : vector<4x1xf32> to vector<4x1xf32>
    %36 = vector.broadcast %35 : vector<4x1xf32> to vector<4x2xf32>
    %c1_20 = arith.constant 1 : index
    %c0_21 = arith.constant 0 : index
    %c2_22 = arith.constant 2 : index
    %37 = vector.load %arg5[%c1_20, %c0_21, %c2_22] : memref<4x4x8xf32, #tpu.memory_space<vmem>>, vector<1x4x2xf32>
    %38 = vector.shape_cast %37 : vector<1x4x2xf32> to vector<4x2xf32>
    %39 = vector.shape_cast %36 : vector<4x2xf32> to vector<1x4x2xf32>
    tpu.vector_store %arg5[%c1_20, %c0_21, %c2_22], %39 {strides = array<i32>} : memref<4x4x8xf32, #tpu.memory_space<vmem>>, vector<1x4x2xf32>,
    %40 = vector.extract_strided_slice %27 {offsets = [0, 2], sizes = [4, 1], strides = [1, 1]} : vector<4x4xf32> to vector<4x1xf32>
    %41 = vector.shape_cast %40 : vector<4x1xf32> to vector<4x1xf32>
    %42 = vector.broadcast %41 : vector<4x1xf32> to vector<4x2xf32>
    %c1_23 = arith.constant 1 : index
    %c0_24 = arith.constant 0 : index
    %c4_25 = arith.constant 4 : index
    %43 = vector.load %arg5[%c1_23, %c0_24, %c4_25] : memref<4x4x8xf32, #tpu.memory_space<vmem>>, vector<1x4x2xf32>
    %44 = vector.shape_cast %43 : vector<1x4x2xf32> to vector<4x2xf32>
    %45 = vector.shape_cast %42 : vector<4x2xf32> to vector<1x4x2xf32>
    tpu.vector_store %arg5[%c1_23, %c0_24, %c4_25], %45 {strides = array<i32>} : memref<4x4x8xf32, #tpu.memory_space<vmem>>, vector<1x4x2xf32>,
    %46 = vector.extract_strided_slice %27 {offsets = [0, 3], sizes = [4, 1], strides = [1, 1]} : vector<4x4xf32> to vector<4x1xf32>
    %47 = vector.shape_cast %46 : vector<4x1xf32> to vector<4x1xf32>
    %48 = vector.broadcast %47 : vector<4x1xf32> to vector<4x2xf32>
    %c1_26 = arith.constant 1 : index
    %c0_27 = arith.constant 0 : index
    %c6_28 = arith.constant 6 : index
    %49 = vector.load %arg5[%c1_26, %c0_27, %c6_28] : memref<4x4x8xf32, #tpu.memory_space<vmem>>, vector<1x4x2xf32>
    %50 = vector.shape_cast %49 : vector<1x4x2xf32> to vector<4x2xf32>
    %51 = vector.shape_cast %48 : vector<4x2xf32> to vector<1x4x2xf32>
    tpu.vector_store %arg5[%c1_26, %c0_27, %c6_28], %51 {strides = array<i32>} : memref<4x4x8xf32, #tpu.memory_space<vmem>>, vector<1x4x2xf32>,
    %c0_29 = arith.constant 0 : index
    %c2_30 = arith.constant 2 : index
    %c0_31 = arith.constant 0 : index
    %c0_32 = arith.constant 0 : index
    %c0_33 = arith.constant 0 : index
    %52 = vector.load %arg2[%c0_29, %c2_30, %c0_31, %c0_32, %c0_33] : memref<1x4x1x4x4xf32, #tpu.memory_space<vmem>>, vector<1x1x1x4x4xf32>
    %53 = vector.shape_cast %52 : vector<1x1x1x4x4xf32> to vector<4x4xf32>
    %54 = vector.extract_strided_slice %53 {offsets = [0, 0], sizes = [4, 1], strides = [1, 1]} : vector<4x4xf32> to vector<4x1xf32>
    %55 = vector.shape_cast %54 : vector<4x1xf32> to vector<4x1xf32>
    %56 = vector.broadcast %55 : vector<4x1xf32> to vector<4x2xf32>
    %c2_34 = arith.constant 2 : index
    %c0_35 = arith.constant 0 : index
    %c0_36 = arith.constant 0 : index
    %57 = vector.load %arg5[%c2_34, %c0_35, %c0_36] : memref<4x4x8xf32, #tpu.memory_space<vmem>>, vector<1x4x2xf32>
    %58 = vector.shape_cast %57 : vector<1x4x2xf32> to vector<4x2xf32>
    %59 = vector.shape_cast %56 : vector<4x2xf32> to vector<1x4x2xf32>
    tpu.vector_store %arg5[%c2_34, %c0_35, %c0_36], %59 {strides = array<i32>} : memref<4x4x8xf32, #tpu.memory_space<vmem>>, vector<1x4x2xf32>,
    %60 = vector.extract_strided_slice %53 {offsets = [0, 1], sizes = [4, 1], strides = [1, 1]} : vector<4x4xf32> to vector<4x1xf32>
    %61 = vector.shape_cast %60 : vector<4x1xf32> to vector<4x1xf32>
    %62 = vector.broadcast %61 : vector<4x1xf32> to vector<4x2xf32>
    %c2_37 = arith.constant 2 : index
    %c0_38 = arith.constant 0 : index
    %c2_39 = arith.constant 2 : index
    %63 = vector.load %arg5[%c2_37, %c0_38, %c2_39] : memref<4x4x8xf32, #tpu.memory_space<vmem>>, vector<1x4x2xf32>
    %64 = vector.shape_cast %63 : vector<1x4x2xf32> to vector<4x2xf32>
    %65 = vector.shape_cast %62 : vector<4x2xf32> to vector<1x4x2xf32>
    tpu.vector_store %arg5[%c2_37, %c0_38, %c2_39], %65 {strides = array<i32>} : memref<4x4x8xf32, #tpu.memory_space<vmem>>, vector<1x4x2xf32>,
    %66 = vector.extract_strided_slice %53 {offsets = [0, 2], sizes = [4, 1], strides = [1, 1]} : vector<4x4xf32> to vector<4x1xf32>
    %67 = vector.shape_cast %66 : vector<4x1xf32> to vector<4x1xf32>
    %68 = vector.broadcast %67 : vector<4x1xf32> to vector<4x2xf32>
    %c2_40 = arith.constant 2 : index
    %c0_41 = arith.constant 0 : index
    %c4_42 = arith.constant 4 : index
    %69 = vector.load %arg5[%c2_40, %c0_41, %c4_42] : memref<4x4x8xf32, #tpu.memory_space<vmem>>, vector<1x4x2xf32>
    %70 = vector.shape_cast %69 : vector<1x4x2xf32> to vector<4x2xf32>
    %71 = vector.shape_cast %68 : vector<4x2xf32> to vector<1x4x2xf32>
    tpu.vector_store %arg5[%c2_40, %c0_41, %c4_42], %71 {strides = array<i32>} : memref<4x4x8xf32, #tpu.memory_space<vmem>>, vector<1x4x2xf32>,
    %72 = vector.extract_strided_slice %53 {offsets = [0, 3], sizes = [4, 1], strides = [1, 1]} : vector<4x4xf32> to vector<4x1xf32>
    %73 = vector.shape_cast %72 : vector<4x1xf32> to vector<4x1xf32>
    %74 = vector.broadcast %73 : vector<4x1xf32> to vector<4x2xf32>
    %c2_43 = arith.constant 2 : index
    %c0_44 = arith.constant 0 : index
    %c6_45 = arith.constant 6 : index
    %75 = vector.load %arg5[%c2_43, %c0_44, %c6_45] : memref<4x4x8xf32, #tpu.memory_space<vmem>>, vector<1x4x2xf32>
    %76 = vector.shape_cast %75 : vector<1x4x2xf32> to vector<4x2xf32>
    %77 = vector.shape_cast %74 : vector<4x2xf32> to vector<1x4x2xf32>
    tpu.vector_store %arg5[%c2_43, %c0_44, %c6_45], %77 {strides = array<i32>} : memref<4x4x8xf32, #tpu.memory_space<vmem>>, vector<1x4x2xf32>,
    %c0_46 = arith.constant 0 : index
    %c3 = arith.constant 3 : index
    %c0_47 = arith.constant 0 : index
    %c0_48 = arith.constant 0 : index
    %c0_49 = arith.constant 0 : index
    %78 = vector.load %arg2[%c0_46, %c3, %c0_47, %c0_48, %c0_49] : memref<1x4x1x4x4xf32, #tpu.memory_space<vmem>>, vector<1x1x1x4x4xf32>
    %79 = vector.shape_cast %78 : vector<1x1x1x4x4xf32> to vector<4x4xf32>
    %80 = vector.extract_strided_slice %79 {offsets = [0, 0], sizes = [4, 1], strides = [1, 1]} : vector<4x4xf32> to vector<4x1xf32>
    %81 = vector.shape_cast %80 : vector<4x1xf32> to vector<4x1xf32>
    %82 = vector.broadcast %81 : vector<4x1xf32> to vector<4x2xf32>
    %c3_50 = arith.constant 3 : index
    %c0_51 = arith.constant 0 : index
    %c0_52 = arith.constant 0 : index
    %83 = vector.load %arg5[%c3_50, %c0_51, %c0_52] : memref<4x4x8xf32, #tpu.memory_space<vmem>>, vector<1x4x2xf32>
    %84 = vector.shape_cast %83 : vector<1x4x2xf32> to vector<4x2xf32>
    %85 = vector.shape_cast %82 : vector<4x2xf32> to vector<1x4x2xf32>
    tpu.vector_store %arg5[%c3_50, %c0_51, %c0_52], %85 {strides = array<i32>} : memref<4x4x8xf32, #tpu.memory_space<vmem>>, vector<1x4x2xf32>,
    %86 = vector.extract_strided_slice %79 {offsets = [0, 1], sizes = [4, 1], strides = [1, 1]} : vector<4x4xf32> to vector<4x1xf32>
    %87 = vector.shape_cast %86 : vector<4x1xf32> to vector<4x1xf32>
    %88 = vector.broadcast %87 : vector<4x1xf32> to vector<4x2xf32>
    %c3_53 = arith.constant 3 : index
    %c0_54 = arith.constant 0 : index
    %c2_55 = arith.constant 2 : index
    %89 = vector.load %arg5[%c3_53, %c0_54, %c2_55] : memref<4x4x8xf32, #tpu.memory_space<vmem>>, vector<1x4x2xf32>
    %90 = vector.shape_cast %89 : vector<1x4x2xf32> to vector<4x2xf32>
    %91 = vector.shape_cast %88 : vector<4x2xf32> to vector<1x4x2xf32>
    tpu.vector_store %arg5[%c3_53, %c0_54, %c2_55], %91 {strides = array<i32>} : memref<4x4x8xf32, #tpu.memory_space<vmem>>, vector<1x4x2xf32>,
    %92 = vector.extract_strided_slice %79 {offsets = [0, 2], sizes = [4, 1], strides = [1, 1]} : vector<4x4xf32> to vector<4x1xf32>
    %93 = vector.shape_cast %92 : vector<4x1xf32> to vector<4x1xf32>
    %94 = vector.broadcast %93 : vector<4x1xf32> to vector<4x2xf32>
    %c3_56 = arith.constant 3 : index
    %c0_57 = arith.constant 0 : index
    %c4_58 = arith.constant 4 : index
    %95 = vector.load %arg5[%c3_56, %c0_57, %c4_58] : memref<4x4x8xf32, #tpu.memory_space<vmem>>, vector<1x4x2xf32>
    %96 = vector.shape_cast %95 : vector<1x4x2xf32> to vector<4x2xf32>
    %97 = vector.shape_cast %94 : vector<4x2xf32> to vector<1x4x2xf32>
    tpu.vector_store %arg5[%c3_56, %c0_57, %c4_58], %97 {strides = array<i32>} : memref<4x4x8xf32, #tpu.memory_space<vmem>>, vector<1x4x2xf32>,
    %98 = vector.extract_strided_slice %79 {offsets = [0, 3], sizes = [4, 1], strides = [1, 1]} : vector<4x4xf32> to vector<4x1xf32>
    %99 = vector.shape_cast %98 : vector<4x1xf32> to vector<4x1xf32>
    %100 = vector.broadcast %99 : vector<4x1xf32> to vector<4x2xf32>
    %c3_59 = arith.constant 3 : index
    %c0_60 = arith.constant 0 : index
    %c6_61 = arith.constant 6 : index
    %101 = vector.load %arg5[%c3_59, %c0_60, %c6_61] : memref<4x4x8xf32, #tpu.memory_space<vmem>>, vector<1x4x2xf32>
    %102 = vector.shape_cast %101 : vector<1x4x2xf32> to vector<4x2xf32>
    %103 = vector.shape_cast %100 : vector<4x2xf32> to vector<1x4x2xf32>
    tpu.vector_store %arg5[%c3_59, %c0_60, %c6_61], %103 {strides = array<i32>} : memref<4x4x8xf32, #tpu.memory_space<vmem>>, vector<1x4x2xf32>,
    %c0_62 = arith.constant 0 : index
    %c0_63 = arith.constant 0 : index
    %c0_64 = arith.constant 0 : index
    %c0_65 = arith.constant 0 : index
    %104 = vector.load %arg3[%c0_62, %c0_63, %c0_64, %c0_65] : memref<2x2x4x8xf32, #tpu.memory_space<vmem>>, vector<2x2x4x8xf32>
    %c0_66 = arith.constant 0 : index
    %c0_67 = arith.constant 0 : index
    %c0_68 = arith.constant 0 : index
    %105 = vector.load %arg5[%c0_66, %c0_67, %c0_68] : memref<4x4x8xf32, #tpu.memory_space<vmem>>, vector<1x4x8xf32>
    %106 = vector.shape_cast %105 : vector<1x4x8xf32> to vector<4x8xf32>
    %c1_69 = arith.constant 1 : index
    %c0_70 = arith.constant 0 : index
    %c0_71 = arith.constant 0 : index
    %107 = vector.load %arg5[%c1_69, %c0_70, %c0_71] : memref<4x4x8xf32, #tpu.memory_space<vmem>>, vector<1x4x8xf32>
    %108 = vector.shape_cast %107 : vector<1x4x8xf32> to vector<4x8xf32>
    %c2_72 = arith.constant 2 : index
    %c0_73 = arith.constant 0 : index
    %c0_74 = arith.constant 0 : index
    %109 = vector.load %arg5[%c2_72, %c0_73, %c0_74] : memref<4x4x8xf32, #tpu.memory_space<vmem>>, vector<1x4x8xf32>
    %110 = vector.shape_cast %109 : vector<1x4x8xf32> to vector<4x8xf32>
    %c3_75 = arith.constant 3 : index
    %c0_76 = arith.constant 0 : index
    %c0_77 = arith.constant 0 : index
    %111 = vector.load %arg5[%c3_75, %c0_76, %c0_77] : memref<4x4x8xf32, #tpu.memory_space<vmem>>, vector<1x4x8xf32>
    %112 = vector.shape_cast %111 : vector<1x4x8xf32> to vector<4x8xf32>
    %113 = vector.extract_strided_slice %104 {offsets = [0, 0, 0, 0], sizes = [1, 1, 1, 8], strides = [1, 1, 1, 1]} : vector<2x2x4x8xf32> to vector<1x1x1x8xf32>
    %114 = vector.shape_cast %113 : vector<1x1x1x8xf32> to vector<1x8xf32>
    %115 = vector.broadcast %114 : vector<1x8xf32> to vector<4x8xf32>
    %116 = arith.mulf %106, %115 : vector<4x8xf32>
    %117 = vector.extract_strided_slice %104 {offsets = [0, 0, 1, 0], sizes = [1, 1, 1, 8], strides = [1, 1, 1, 1]} : vector<2x2x4x8xf32> to vector<1x1x1x8xf32>
    %118 = vector.shape_cast %117 : vector<1x1x1x8xf32> to vector<1x8xf32>
    %119 = vector.broadcast %118 : vector<1x8xf32> to vector<4x8xf32>
    %120 = arith.mulf %108, %119 : vector<4x8xf32>
    %121 = arith.addf %116, %120 : vector<4x8xf32>
    %122 = vector.extract_strided_slice %104 {offsets = [0, 0, 2, 0], sizes = [1, 1, 1, 8], strides = [1, 1, 1, 1]} : vector<2x2x4x8xf32> to vector<1x1x1x8xf32>
    %123 = vector.shape_cast %122 : vector<1x1x1x8xf32> to vector<1x8xf32>
    %124 = vector.broadcast %123 : vector<1x8xf32> to vector<4x8xf32>
    %125 = arith.mulf %110, %124 : vector<4x8xf32>
    %126 = arith.addf %121, %125 : vector<4x8xf32>
    %127 = vector.extract_strided_slice %104 {offsets = [0, 0, 3, 0], sizes = [1, 1, 1, 8], strides = [1, 1, 1, 1]} : vector<2x2x4x8xf32> to vector<1x1x1x8xf32>
    %128 = vector.shape_cast %127 : vector<1x1x1x8xf32> to vector<1x8xf32>
    %129 = vector.broadcast %128 : vector<1x8xf32> to vector<4x8xf32>
    %130 = arith.mulf %112, %129 : vector<4x8xf32>
    %131 = arith.addf %126, %130 : vector<4x8xf32>
    %c0_78 = arith.constant 0 : index
    %c0_79 = arith.constant 0 : index
    %c0_80 = arith.constant 0 : index
    %c0_81 = arith.constant 0 : index
    %c0_82 = arith.constant 0 : index
    %c0_83 = arith.constant 0 : index
    %132 = vector.load %arg4[%c0_78, %c0_79, %c0_80, %c0_81, %c0_82, %c0_83] : memref<1x1x2x4x2x8xf32, #tpu.memory_space<vmem>>, vector<1x1x1x4x1x8xf32>
    %133 = vector.shape_cast %132 : vector<1x1x1x4x1x8xf32> to vector<4x8xf32>
    %134 = vector.shape_cast %131 : vector<4x8xf32> to vector<1x1x1x4x1x8xf32>
    tpu.vector_store %arg4[%c0_78, %c0_79, %c0_80, %c0_81, %c0_82, %c0_83], %134 {strides = array<i32>} : memref<1x1x2x4x2x8xf32, #tpu.memory_space<vmem>>, vector<1x1x1x4x1x8xf32>,
    %135 = vector.extract_strided_slice %104 {offsets = [0, 1, 0, 0], sizes = [1, 1, 1, 8], strides = [1, 1, 1, 1]} : vector<2x2x4x8xf32> to vector<1x1x1x8xf32>
    %136 = vector.shape_cast %135 : vector<1x1x1x8xf32> to vector<1x8xf32>
    %137 = vector.broadcast %136 : vector<1x8xf32> to vector<4x8xf32>
    %138 = arith.mulf %106, %137 : vector<4x8xf32>
    %139 = vector.extract_strided_slice %104 {offsets = [0, 1, 1, 0], sizes = [1, 1, 1, 8], strides = [1, 1, 1, 1]} : vector<2x2x4x8xf32> to vector<1x1x1x8xf32>
    %140 = vector.shape_cast %139 : vector<1x1x1x8xf32> to vector<1x8xf32>
    %141 = vector.broadcast %140 : vector<1x8xf32> to vector<4x8xf32>
    %142 = arith.mulf %108, %141 : vector<4x8xf32>
    %143 = arith.addf %138, %142 : vector<4x8xf32>
    %144 = vector.extract_strided_slice %104 {offsets = [0, 1, 2, 0], sizes = [1, 1, 1, 8], strides = [1, 1, 1, 1]} : vector<2x2x4x8xf32> to vector<1x1x1x8xf32>
    %145 = vector.shape_cast %144 : vector<1x1x1x8xf32> to vector<1x8xf32>
    %146 = vector.broadcast %145 : vector<1x8xf32> to vector<4x8xf32>
    %147 = arith.mulf %110, %146 : vector<4x8xf32>
    %148 = arith.addf %143, %147 : vector<4x8xf32>
    %149 = vector.extract_strided_slice %104 {offsets = [0, 1, 3, 0], sizes = [1, 1, 1, 8], strides = [1, 1, 1, 1]} : vector<2x2x4x8xf32> to vector<1x1x1x8xf32>
    %150 = vector.shape_cast %149 : vector<1x1x1x8xf32> to vector<1x8xf32>
    %151 = vector.broadcast %150 : vector<1x8xf32> to vector<4x8xf32>
    %152 = arith.mulf %112, %151 : vector<4x8xf32>
    %153 = arith.addf %148, %152 : vector<4x8xf32>
    %c0_84 = arith.constant 0 : index
    %c0_85 = arith.constant 0 : index
    %c0_86 = arith.constant 0 : index
    %c0_87 = arith.constant 0 : index
    %c1_88 = arith.constant 1 : index
    %c0_89 = arith.constant 0 : index
    %154 = vector.load %arg4[%c0_84, %c0_85, %c0_86, %c0_87, %c1_88, %c0_89] : memref<1x1x2x4x2x8xf32, #tpu.memory_space<vmem>>, vector<1x1x1x4x1x8xf32>
    %155 = vector.shape_cast %154 : vector<1x1x1x4x1x8xf32> to vector<4x8xf32>
    %156 = vector.shape_cast %153 : vector<4x8xf32> to vector<1x1x1x4x1x8xf32>
    tpu.vector_store %arg4[%c0_84, %c0_85, %c0_86, %c0_87, %c1_88, %c0_89], %156 {strides = array<i32>} : memref<1x1x2x4x2x8xf32, #tpu.memory_space<vmem>>, vector<1x1x1x4x1x8xf32>,
    %157 = vector.extract_strided_slice %104 {offsets = [1, 0, 0, 0], sizes = [1, 1, 1, 8], strides = [1, 1, 1, 1]} : vector<2x2x4x8xf32> to vector<1x1x1x8xf32>
    %158 = vector.shape_cast %157 : vector<1x1x1x8xf32> to vector<1x8xf32>
    %159 = vector.broadcast %158 : vector<1x8xf32> to vector<4x8xf32>
    %160 = arith.mulf %106, %159 : vector<4x8xf32>
    %161 = vector.extract_strided_slice %104 {offsets = [1, 0, 1, 0], sizes = [1, 1, 1, 8], strides = [1, 1, 1, 1]} : vector<2x2x4x8xf32> to vector<1x1x1x8xf32>
    %162 = vector.shape_cast %161 : vector<1x1x1x8xf32> to vector<1x8xf32>
    %163 = vector.broadcast %162 : vector<1x8xf32> to vector<4x8xf32>
    %164 = arith.mulf %108, %163 : vector<4x8xf32>
    %165 = arith.addf %160, %164 : vector<4x8xf32>
    %166 = vector.extract_strided_slice %104 {offsets = [1, 0, 2, 0], sizes = [1, 1, 1, 8], strides = [1, 1, 1, 1]} : vector<2x2x4x8xf32> to vector<1x1x1x8xf32>
    %167 = vector.shape_cast %166 : vector<1x1x1x8xf32> to vector<1x8xf32>
    %168 = vector.broadcast %167 : vector<1x8xf32> to vector<4x8xf32>
    %169 = arith.mulf %110, %168 : vector<4x8xf32>
    %170 = arith.addf %165, %169 : vector<4x8xf32>
    %171 = vector.extract_strided_slice %104 {offsets = [1, 0, 3, 0], sizes = [1, 1, 1, 8], strides = [1, 1, 1, 1]} : vector<2x2x4x8xf32> to vector<1x1x1x8xf32>
    %172 = vector.shape_cast %171 : vector<1x1x1x8xf32> to vector<1x8xf32>
    %173 = vector.broadcast %172 : vector<1x8xf32> to vector<4x8xf32>
    %174 = arith.mulf %112, %173 : vector<4x8xf32>
    %175 = arith.addf %170, %174 : vector<4x8xf32>
    %c0_90 = arith.constant 0 : index
    %c0_91 = arith.constant 0 : index
    %c1_92 = arith.constant 1 : index
    %c0_93 = arith.constant 0 : index
    %c0_94 = arith.constant 0 : index
    %c0_95 = arith.constant 0 : index
    %176 = vector.load %arg4[%c0_90, %c0_91, %c1_92, %c0_93, %c0_94, %c0_95] : memref<1x1x2x4x2x8xf32, #tpu.memory_space<vmem>>, vector<1x1x1x4x1x8xf32>
    %177 = vector.shape_cast %176 : vector<1x1x1x4x1x8xf32> to vector<4x8xf32>
    %178 = vector.shape_cast %175 : vector<4x8xf32> to vector<1x1x1x4x1x8xf32>
    tpu.vector_store %arg4[%c0_90, %c0_91, %c1_92, %c0_93, %c0_94, %c0_95], %178 {strides = array<i32>} : memref<1x1x2x4x2x8xf32, #tpu.memory_space<vmem>>, vector<1x1x1x4x1x8xf32>,
    %179 = vector.extract_strided_slice %104 {offsets = [1, 1, 0, 0], sizes = [1, 1, 1, 8], strides = [1, 1, 1, 1]} : vector<2x2x4x8xf32> to vector<1x1x1x8xf32>
    %180 = vector.shape_cast %179 : vector<1x1x1x8xf32> to vector<1x8xf32>
    %181 = vector.broadcast %180 : vector<1x8xf32> to vector<4x8xf32>
    %182 = arith.mulf %106, %181 : vector<4x8xf32>
    %183 = vector.extract_strided_slice %104 {offsets = [1, 1, 1, 0], sizes = [1, 1, 1, 8], strides = [1, 1, 1, 1]} : vector<2x2x4x8xf32> to vector<1x1x1x8xf32>
    %184 = vector.shape_cast %183 : vector<1x1x1x8xf32> to vector<1x8xf32>
    %185 = vector.broadcast %184 : vector<1x8xf32> to vector<4x8xf32>
    %186 = arith.mulf %108, %185 : vector<4x8xf32>
    %187 = arith.addf %182, %186 : vector<4x8xf32>
    %188 = vector.extract_strided_slice %104 {offsets = [1, 1, 2, 0], sizes = [1, 1, 1, 8], strides = [1, 1, 1, 1]} : vector<2x2x4x8xf32> to vector<1x1x1x8xf32>
    %189 = vector.shape_cast %188 : vector<1x1x1x8xf32> to vector<1x8xf32>
    %190 = vector.broadcast %189 : vector<1x8xf32> to vector<4x8xf32>
    %191 = arith.mulf %110, %190 : vector<4x8xf32>
    %192 = arith.addf %187, %191 : vector<4x8xf32>
    %193 = vector.extract_strided_slice %104 {offsets = [1, 1, 3, 0], sizes = [1, 1, 1, 8], strides = [1, 1, 1, 1]} : vector<2x2x4x8xf32> to vector<1x1x1x8xf32>
    %194 = vector.shape_cast %193 : vector<1x1x1x8xf32> to vector<1x8xf32>
    %195 = vector.broadcast %194 : vector<1x8xf32> to vector<4x8xf32>
    %196 = arith.mulf %112, %195 : vector<4x8xf32>
    %197 = arith.addf %192, %196 : vector<4x8xf32>
    %c0_96 = arith.constant 0 : index
    %c0_97 = arith.constant 0 : index
    %c1_98 = arith.constant 1 : index
    %c0_99 = arith.constant 0 : index
    %c1_100 = arith.constant 1 : index
    %c0_101 = arith.constant 0 : index
    %198 = vector.load %arg4[%c0_96, %c0_97, %c1_98, %c0_99, %c1_100, %c0_101] : memref<1x1x2x4x2x8xf32, #tpu.memory_space<vmem>>, vector<1x1x1x4x1x8xf32>
    %199 = vector.shape_cast %198 : vector<1x1x1x4x1x8xf32> to vector<4x8xf32>
    %200 = vector.shape_cast %197 : vector<4x8xf32> to vector<1x1x1x4x1x8xf32>
    tpu.vector_store %arg4[%c0_96, %c0_97, %c1_98, %c0_99, %c1_100, %c0_101], %200 {strides = array<i32>} : memref<1x1x2x4x2x8xf32, #tpu.memory_space<vmem>>, vector<1x1x1x4x1x8xf32>,
    return
  }
  func.func @transform_0(%arg0: i32, %arg1: i32) -> (i32, i32, i32, i32, i32) {
    %c0_i32 = arith.constant 0 : i32
    %c0_i32_0 = arith.constant 0 : i32
    %c0_i32_1 = arith.constant 0 : i32
    %c0_i32_2 = arith.constant 0 : i32
    return %arg0, %c0_i32, %arg1, %c0_i32_0, %c0_i32_1 : i32, i32, i32, i32, i32
  }
  func.func @transform_1(%arg0: i32, %arg1: i32) -> (i32, i32, i32, i32) {
    %c0_i32 = arith.constant 0 : i32
    %c0_i32_0 = arith.constant 0 : i32
    %c0_i32_1 = arith.constant 0 : i32
    %c0_i32_2 = arith.constant 0 : i32
    %c0_i32_3 = arith.constant 0 : i32
    return %c0_i32, %c0_i32_0, %c0_i32_1, %c0_i32_2 : i32, i32, i32, i32
  }
  func.func @transform_2(%arg0: i32, %arg1: i32) -> (i32, i32, i32, i32, i32, i32) {
    %c0_i32 = arith.constant 0 : i32
    %c0_i32_0 = arith.constant 0 : i32
    %c0_i32_1 = arith.constant 0 : i32
    %c0_i32_2 = arith.constant 0 : i32
    %c0_i32_3 = arith.constant 0 : i32
    return %arg0, %arg1, %c0_i32, %c0_i32_0, %c0_i32_1, %c0_i32_2 : i32, i32, i32, i32, i32, i32
  }
}

</mosaic_0001>

<bundles_post_ra>
// kernel: unfilt_backproj_3d.1
= control target key start
LH: loop header
LB: loop body
LE: loop exit
PB: predicated region body
PF: predicated region fallthrough
CT: control target
= control target key end

     0   :  { %7 = vsyncpa [#allocation4], 0  ;;  %s1167_s0 = inlined_call_operand.hbm [shape: f32[2,4,4,4,4], index: 0, kind: input, shape index: {}]   ;;  %s1168_s1 = inlined_call_operand.vmem [shape: f32[2,2,4,8], index: 1, kind: input, shape index: {}]   ;;  %s1169_s2 = inlined_call_operand.hbm [shape: f32[2,4,2,4,2,8], index: 2, kind: output, shape index: {}]  }
   0x1   :  { %9 = vsyncpa [#allocation4 + $0x1], 0 }
   0x2   :  { %10 = vsyncpa [#allocation5], 0 }
   0x3   :  { %12 = vsyncpa [#allocation5 + $0x1], 0  ;;  %s902_s9 = smov 0   ;;  %s904_s10 = smov 0  }
   0x4   :  { %s906_s11 = smov 0   ;;  %s908_s12 = smov 0  }
   0x5   :  { %s910_s13 = smov 0   ;;  %s912_s14 = smov 0  }
   0x6   :  { %s914_s15 = smov 0   ;;  %s916_s16 = smov 0  }
   0x7 LB: > { %s616_s17 = sadd.s32 4294967295, %s873_s16   ;;  %s617_s18 = sadd.s32 4294967294, %s873_s16   ;;  %s873_s16 = sphi %s916_s16, %s18_s16   ;;  %s869_s15 = sphi %s914_s15, %s1184_s15   ;;  %s865_s14 = sphi %s912_s14, %s1183_s14   ;;  %s861_s13 = sphi %s910_s13, %s1182_s13   ;;  %s857_s12 = sphi %s908_s12, %s1181_s12   ;;  %s853_s11 = sphi %s906_s11, %s1180_s11   ;;  %s849_s10 = sphi %s904_s10, %s1179_s10   ;;  %s845_s9 = sphi %s902_s9, %s1178_s9  }
   0x8   : > { %s27_s19 = sadd.s32 1, %s865_s14  ;;  %s30_s20 = sadd.s32 1, %s869_s15 }
   0x9   : > { %p28_p0 = scmp.ge.s32.totalorder %s27_s19, 4  ;;  %s39_s21 = sadd.s32 1, %s853_s11 }
   0xa   : > { %p46_p1 = scmp.ne.s32.totalorder %s853_s11, %s849_s10  ;;  %p47_p2 = scmp.eq.s32.totalorder %s873_s16, 0 }
   0xb   : > { %s1186_s19 = smov (%p28_p0, %s27_s19), 0  ;;  %s1188_s20 = smov (!%p28_p0, %s30_s20), %s869_s15 }
   0xc   : > { %s35_s22 = ssub.s32 %s865_s14, %s1186_s19  ;;  %p955_p3 = por %p47_p2, %p46_p1 }
   0xd   : > { %p32_p4 = scmp.ge.s32.totalorder %s1188_s20, 2  ;;  %p52_p5 = scmp.ne.s32.totalorder %s849_s10, %s845_s9 }
   0xe   : > { %p53_p6 = scmp.eq.s32.totalorder %s616_s17, 0  ;;  %p99_p7 = scmp.eq.s32.totalorder %s616_s17, 7 }
   0xf   : > { %s1190_s20 = smov (%p32_p4, %s1188_s20), 0  ;;  %p105_p10 = scmp.eq.s32.totalorder %s617_s18, 7 }
  0x10   : > { %p963_p8 = por %p53_p6, %p52_p5  ;;  %p967_p9 = por %p99_p7, %p46_p1 }
  0x11   : > { %s34_s26 = ssub.s32 %s869_s15, %s1190_s20  ;;  %p973_p12 = por %p105_p10, %p52_p5 }
  0x12   : > { %s1173_s25 = scalar_select %p967_p9, 1, 0 }
  0x13   : > { %s36_s27 = sor.u32 %s35_s22, %s34_s26  ;;  %p655_p13 = scmp.lt.s32.totalorder %s873_s16, 8 }
  0x14   : > { %p37_p11 = scmp.eq.s32.totalorder %s36_s27, 0  ;;  %s128_s29 = sand.u32 1, %s853_s11  }
  0x15   : > { %s1174_s28 = scalar_select %p973_p12, 1, 0 }
  0x16   : > { %s980_s30 = scalar_select %p37_p11, %s853_s11, %s39_s21  }
  0x17   : > { %s620_s3 = sshll.u32 %s128_s29, 4  ;;  %s621_s4 = sshll.u32 %s869_s15, 4 }
  0x18   : > { %s137_s5 = sadd.s32 %s865_s14, %s621_s4  ;;  %s132_s6 = scalar_lea.vmem [#allocation3], %s620_s3 }
  0x19   : > { %s140_s7 = sshll.u32 %s132_s6, 4  ;;  %s622_s8 = sshll.u32 %s137_s5, 6  ;;  %s984_s7 = int_to_ptr.vmem [resolvable:$true] %s140_s7 }
  0x1a   : > { %s989_s22 = scalar_lea.hbm %s1167_s0, %s622_s8  ;;  %p993_p0 = pnand %p655_p13, %p955_p3 }
  0x1b   : > { %s997_s26 = scalar_lea.sflag [#allocation4], %s128_s29  ;;  %s745_s27 = scalar_lea.hbm %s989_s22, 256 }
  0x1c   : > { %p746_p1 = scmp.ne.s32.totalorder %s989_s22, %s745_s27  ;;  %p747_p2 = pneg %p993_p0 }
  0x1d   : > { %s750_s4 = scalar_lea.hbm %s1167_s0, 2048  ;;  %p751_p3 = scmp.lt.u32.totalorder %s989_s22, %s1167_s0 }
  0x1e   : > { %p748_p4 = pnand %p747_p2, %p746_p1  ;;  %p752_p6 = scmp.lt.u32.totalorder %s750_s4, %s745_s27 }
  0x1f   : > { %p754_p10 = scmp.lt.u32.totalorder %s745_s27, %s989_s22 }
  0x20   : > { %p749_p5 = pneg %p748_p4  ;;  %p753_p7 = por %p752_p6, %p751_p3 }
  0x22   : > { %p755_p11 = por %p754_p10, %p753_p7 }
  0x24   : > { %p756_p13 = pnand %p755_p11, %p749_p5 }
  0x26   : > { %759 = shalt.err (!%p756_p13)
}
  0x27   : > { %s760_s29 = scalar_lea.vmem %s984_s7, 256  ;;  %s875_s8 = smov [#allocation3]  }
  0x28   : > { %p761_p1 = scmp.ne.s32.totalorder %s984_s7, %s760_s29  ;;  %s765_s17 = sshll.u32 %s875_s8, 4  ;;  %s766_s17 = int_to_ptr.vmem [resolvable:$false] %s765_s17 }
  0x29   : > { %s767_s18 = scalar_lea.vmem %s766_s17, 512  ;;  %p768_p9 = scmp.lt.s32.totalorder %s984_s7, %s766_s17 }
  0x2a   : > { %p763_p4 = pnand %p761_p1, %p747_p2  ;;  %p769_p3 = scmp.lt.s32.totalorder %s767_s18, %s760_s29 }
  0x2c   : > { %p764_p12 = pneg %p763_p4  ;;  %p770_p6 = por %p769_p3, %p768_p9 }
  0x2e   : > { %p771_p7 = pnand %p770_p6, %p764_p12 }
  0x30   : > { %774 = shalt.err (!%p771_p7)
}
  0x31   : > { %s876_s27 = smov 256   ;;  %s877_s23 = smov 64  }
  0x32   : > { %s878_s3 = smov 4   ;;  %p623_p2 = scmp.ge.s32.totalorder %s873_s16, 1 }
  0x33   : > { %650 = dma.hbm_to_vmem [thread:$0]  (!%p993_p0), %s989_s22, 256, %s984_s7, %s997_s26, %s876_s27, %s877_s23, %s878_s3  }
  0x34   : > { %p148_p5 = scmp.lt.s32.totalorder %s873_s16, 9 }
  0x36   : > { %p149_p10 = pnand %p623_p2, %p148_p5 }
  0x37   : > { %s1028_s4 = sand.u32 (!%p149_p10), 1, %s849_s10  }
  0x38   : > { %152 = sbr.rel (%p149_p10) target bundleno = 277 (0x115), region = 28  ;;  %s624_s5 = sshll.u32 (!%p149_p10), %s1028_s4, 4 }
  0x39   : > { %s155_s6 = scalar_lea.sflag (!%p149_p10), [#allocation4], %s1028_s4  ;;  %s158_s29 = scalar_lea.vmem (!%p149_p10), [#allocation3], %s624_s5 }
  0x3f   : > { %836 = dma.done.wait (%p963_p8), %s155_s6, 256  }
  0x40   : > { %838 = vsyncadd (%p963_p8), %s155_s6, 4294967040  ;;  %v879_v0 = vmov 1   ;;  %v880_v1 = vmov 0   ;;  %v179_v2 = vld [vmem:[%s158_s29] sm:$0xf]  ;;  %v881_v4 = vmov 2   ;;  %v285_v20 = vlaneseq }
  0x41   : > { %732 = vset.pattern.permute.xlu1 %v879_v0  ;;  %731 = vset.pattern.permute.xlu0 %v880_v1  ;;  %v626_v3 = vld [vmem:[%s158_s29 + $0x4] sm:$0xf]  ;;  %v882_v5 = vmov 3   ;;  %v627_v6 = vld [vmem:[%s158_s29 + $0x8] sm:$0xf]  ;;  %vm185_vm0 = vcmask 11264  }
  0x42   : > { %188 = vperm.xlu1 %732, %v179_v2   ;;  %182 = vperm.xlu0 %731, %v179_v2   ;;  %v628_v7 = vld [vmem:[%s158_s29 + $0xc] sm:$0xf]  ;;  %vm191_vm1 = vcmask 27664   ;;  %vm197_vm2 = vcmask 44064   ;;  %vm203_vm3 = vcmask 60464   ;;  %v286_v22 = vshrl.u32 %v285_v20, 7 }
  0x43   : > { %v277_v24 = vld [vmem:[%s1168_s1] sm:$0xf]  ;;  %v278_v25 = vld [vmem:[%s1168_s1 + $0x4] sm:$0xf]  ;;  %v279_v27 = vld [vmem:[%s1168_s1 + $0x8] sm:$0xf] }
  0x44   : > { %v287_v26 = vsub.s32 0, %v286_v22  ;;  %v280_v28 = vld [vmem:[%s1168_s1 + $0xc] sm:$0xf]  ;;  %v292_v29 = vsub.s32 1, %v286_v22  ;;  %v298_v30 = vsub.s32 2, %v286_v22  ;;  %v304_v48 = vsub.s32 3, %v286_v22 }
  0x45   : > { %v883_v41 = vmov 1966171168   ;;  %s638_s27 = sshll.u32 %s857_s12, 3  ;;  %s639_s23 = sshll.u32 %s861_s13, 5  ;;  %vm337_vm4 = vcmask 57344  }
  0x46   : > { %215 = vperm.xlu1 %732, %v626_v3   ;;  %209 = vperm.xlu0 %731, %v626_v3   ;;  %v288_v32 = vrot.slane %v277_v24, %v287_v26  ;;  %v345_v33 = vrot.slane %v278_v25, %v287_v26  ;;  %v401_v34 = vrot.slane %v279_v27, %v287_v26  ;;  %v310_v42 = vunpack.c.l.s4 %v883_v41  ;;  %s1068_s3 = sadd.s32 %s639_s23, %s638_s27  ;;  %s1073_s13 = scalar_lea.vmem [#allocation6], %s624_s5 }
  0x47   : > { %v458_v35 = vrot.slane %v280_v28, %v287_v26  ;;  %v293_v37 = vrot.slane %v277_v24, %v292_v29  ;;  %v350_v38 = vrot.slane %v278_v25, %v292_v29  ;;  %v406_v39 = vrot.slane %v279_v27, %v292_v29  ;;  %s640_s12 = sshll.u32 %s1068_s3, 5  ;;  %s527_s6 = sshll.u32 %s1073_s13, 4  ;;  %s1097_s6 = int_to_ptr.vmem [resolvable:$true] %s527_s6 }
  0x48   : > { %v463_v40 = vrot.slane %v280_v28, %v292_v29  ;;  %v299_v44 = vrot.slane %v277_v24, %v298_v30  ;;  %v356_v45 = vrot.slane %v278_v25, %v298_v30  ;;  %v412_v46 = vrot.slane %v279_v27, %v298_v30  ;;  %s1095_s24 = scalar_lea.hbm %s1169_s2, %s640_s12  ;;  %s512_s7 = scalar_lea.sflag [#allocation5], %s1028_s4 }
  0x49   : > { %v469_v47 = vrot.slane %v280_v28, %v298_v30  ;;  %v311_v59 = vunpack.c.0.s8 %v310_v42  ;;  %s775_s22 = scalar_lea.vmem %s1097_s6, 256  ;;  %p1176_p9 = scmp.ne.s32.totalorder %s1173_s25, 0 }
  0x4a   : > { %733 = vset.pattern.permute.xlu1 %v881_v4  ;;  %735 = vset.pattern.permute.xlu0 %v882_v5  ;;  %p776_p8 = scmp.ne.s32.totalorder %s1097_s6, %s775_s22  ;;  %s884_s21 = smov [#allocation6]  }
  0x4b   : > { %220 = vperm.xlu1 %733, %v626_v3   ;;  %200 = vperm.xlu0 %735, %v179_v2   ;;  %s779_s26 = sshll.u32 %s884_s21, 4  ;;  %s780_s26 = int_to_ptr.vmem [resolvable:$false] %s779_s26 }
  0x4c   : > { %p777_p12 = pnand %p776_p8, %p1176_p9  ;;  %s781_s8 = scalar_lea.vmem %s780_s26, 512 }
  0x4d   : > { %p782_p11 = scmp.lt.s32.totalorder %s1097_s6, %s780_s26  ;;  %p783_p13 = scmp.lt.s32.totalorder %s781_s8, %s775_s22 }
  0x4e   : > { %p778_p0 = pneg %p777_p12 }
  0x4f   : > { %734 = vset.pattern.permute.xlu1 %v880_v1  ;;  %736 = vset.pattern.permute.xlu0 %v881_v4  ;;  %p784_p1 = por %p783_p13, %p782_p11 }
  0x50   : > { %233 = vperm.xlu1 %734, %v627_v6   ;;  %194 = vperm.xlu0 %736, %v179_v2   ;;  %v418_v2 = vrot.slane %v279_v27, %v304_v48 }
  0x51   : > { %p785_p4 = pnand %p784_p1, %p778_p0 }
  0x54   : > { %737 = vset.pattern.permute.xlu1 %v882_v5  ;;  %244 = vperm.xlu0 %736, %v627_v6  }
  0x55   : > { %225 = vperm.xlu1 %737, %v626_v3   ;;  %v475_v3 = vrot.slane %v280_v28, %v304_v48 }
  0x58   : > { %741 = vset.pattern.permute.xlu0 %v879_v0 }
  0x59   : > { %738 = vset.pattern.permute.xlu1 %v879_v0  ;;  %263 = vperm.xlu0 %741, %v628_v7   ;;  %v305_v0 = vrot.slane %v277_v24, %v304_v48 }
  0x5a   : > { %239 = vperm.xlu1 %738, %v627_v6  }
  0x5d   : > { %744 = vset.pattern.permute.xlu0 %v882_v5 }
  0x5e   : > { %739 = vset.pattern.permute.xlu1 %v880_v1  ;;  %v362_v1 = vrot.slane %v278_v25, %v304_v48 }
  0x5f   : > { %257 = vperm.xlu1 %739, %v628_v7  }
  0x63   : > { %740 = vset.pattern.permute.xlu1 %v882_v5 }
  0x64   : > { %249 = vperm.xlu1 %740, %v627_v6  }
  0x68   : > { %742 = vset.pattern.permute.xlu1 %v881_v4 }
  0x69   : > { %268 = vperm.xlu1 %742, %v628_v7  }
  0x6d   : > { %743 = vset.pattern.permute.xlu1 %v882_v5 }
  0x6e   : > { %273 = vperm.xlu1 %743, %v628_v7  }
  0xc1   : > { %v189_v8 = vpop.permute.xlu1 %188  ;;  %v183_v9 = vpop.permute.xlu0 %182 }
  0xc2   : > { %186 = vst.msk [vmem:[#allocation2] sm:$0xf] %vm185_vm0, %v183_v9 }
  0xc3   : > { %192 = vst.msk [vmem:[#allocation2] sm:$0xf] %vm191_vm1, %v189_v8  ;;  %v314_v8 = vsub.s32 %v311_v59, %v286_v22 }
  0xc5   : > { %v216_v10 = vpop.permute.xlu1 %215  ;;  %v210_v11 = vpop.permute.xlu0 %209 }
  0xc6   : > { %213 = vst.msk [vmem:[#allocation2 + $0x4] sm:$0xf] %vm185_vm0, %v210_v11 }
  0xc7   : > { %218 = vst.msk [vmem:[#allocation2 + $0x4] sm:$0xf] %vm191_vm1, %v216_v10 }
  0xca   : > { %v221_v12 = vpop.permute.xlu1 %220  ;;  %v201_v13 = vpop.permute.xlu0 %200 }
  0xcb   : > { %223 = vst.msk [vmem:[#allocation2 + $0x4] sm:$0xf] %vm197_vm2, %v221_v12 }
  0xcf   : > { %v234_v14 = vpop.permute.xlu1 %233  ;;  %v195_v15 = vpop.permute.xlu0 %194 }
  0xd0   : > { %237 = vst.msk [vmem:[#allocation2 + $0x8] sm:$0xf] %vm185_vm0, %v234_v14 }
  0xd1   : > { %198 = vst.msk [vmem:[#allocation2] sm:$0xf] %vm197_vm2, %v195_v15 }
  0xd2   : > { %204 = vst.msk [vmem:[#allocation2] sm:$0xf] %vm203_vm3, %v201_v13 }
  0xd3   : > { %v245_v17 = vpop.permute.xlu0 %244 }
  0xd4   : > { %v226_v16 = vpop.permute.xlu1 %225 }
  0xd5   : > { %228 = vst.msk [vmem:[#allocation2 + $0x4] sm:$0xf] %vm203_vm3, %v226_v16 }
  0xd8   : > { %v264_v19 = vpop.permute.xlu0 %263 }
  0xd9   : > { %v240_v18 = vpop.permute.xlu1 %239  ;;  %v281_v36 = vld [vmem:[#allocation2] sm:$0xf] }
  0xda   : > { %242 = vst.msk [vmem:[#allocation2 + $0x8] sm:$0xf] %vm191_vm1, %v240_v18  ;;  %v289_v50 = vmul.f32 %v288_v32, %v281_v36  ;;  %v346_v51 = vmul.f32 %v345_v33, %v281_v36  ;;  %v402_v52 = vmul.f32 %v401_v34, %v281_v36  ;;  %v459_v53 = vmul.f32 %v458_v35, %v281_v36 }
  0xdb   : > { %247 = vst.msk [vmem:[#allocation2 + $0x8] sm:$0xf] %vm197_vm2, %v245_v17 }
  0xdc   : > { %v282_v43 = vld [vmem:[#allocation2 + $0x4] sm:$0xf] }
  0xdd   : > { %v294_v55 = vmul.f32 %v293_v37, %v282_v43  ;;  %v351_v56 = vmul.f32 %v350_v38, %v282_v43  ;;  %v407_v57 = vmul.f32 %v406_v39, %v282_v43  ;;  %v464_v58 = vmul.f32 %v463_v40, %v282_v43 }
  0xde   : > { %v258_v21 = vpop.permute.xlu1 %257 }
  0xdf   : > { %261 = vst.msk [vmem:[#allocation2 + $0xc] sm:$0xf] %vm185_vm0, %v258_v21  ;;  %v295_v4 = vadd.f32 %v294_v55, %v289_v50  ;;  %v352_v5 = vadd.f32 %v351_v56, %v346_v51  ;;  %v408_v6 = vadd.f32 %v407_v57, %v402_v52  ;;  %v465_v7 = vadd.f32 %v464_v58, %v459_v53 }
  0xe0   : > { %266 = vst.msk [vmem:[#allocation2 + $0xc] sm:$0xf] %vm191_vm1, %v264_v19 }
  0xe3   : > { %v250_v23 = vpop.permute.xlu1 %249 }
  0xe4   : > { %252 = vst.msk [vmem:[#allocation2 + $0x8] sm:$0xf] %vm203_vm3, %v250_v23 }
  0xe8   : > { %v269_v31 = vpop.permute.xlu1 %268 }
  0xe9   : > { %271 = vst.msk [vmem:[#allocation2 + $0xc] sm:$0xf] %vm197_vm2, %v269_v31 }
  0xeb   : > { %v283_v54 = vld [vmem:[#allocation2 + $0x8] sm:$0xf] }
  0xec   : > { %v300_v60 = vmul.f32 %v299_v44, %v283_v54  ;;  %v357_v61 = vmul.f32 %v356_v45, %v283_v54  ;;  %v413_v62 = vmul.f32 %v412_v46, %v283_v54  ;;  %v470_v63 = vmul.f32 %v469_v47, %v283_v54 }
  0xed   : > { %v274_v49 = vpop.permute.xlu1 %273 }
  0xee   : > { %276 = vst.msk [vmem:[#allocation2 + $0xc] sm:$0xf] %vm203_vm3, %v274_v49  ;;  %v301_v9 = vadd.f32 %v300_v60, %v295_v4  ;;  %v358_v10 = vadd.f32 %v357_v61, %v352_v5  ;;  %v414_v11 = vadd.f32 %v413_v62, %v408_v6  ;;  %v471_v12 = vadd.f32 %v470_v63, %v465_v7 }
  0xf5   : > { %v284_v13 = vld [vmem:[#allocation2 + $0xc] sm:$0xf] }
  0xf6   : > { %v306_v14 = vmul.f32 %v305_v0, %v284_v13  ;;  %v363_v15 = vmul.f32 %v362_v1, %v284_v13  ;;  %v419_v16 = vmul.f32 %v418_v2, %v284_v13  ;;  %v476_v17 = vmul.f32 %v475_v3, %v284_v13 }
  0xf8   : > { %v307_v18 = vadd.f32 %v306_v14, %v301_v9  ;;  %v364_v19 = vadd.f32 %v363_v15, %v358_v10  ;;  %v420_v20 = vadd.f32 %v419_v16, %v414_v11  ;;  %v477_v21 = vadd.f32 %v476_v17, %v471_v12 }
  0xfa   : > { %v315_v23 = vrot.slane %v307_v18, %v314_v8  ;;  %v372_v24 = vrot.slane %v364_v19, %v314_v8  ;;  %v428_v25 = vrot.slane %v420_v20, %v314_v8  ;;  %v485_v22 = vrot.slane %v477_v21, %v314_v8 }
  0xfc   : > { %v316_v26 = vcombine.high %v315_v23, %v315_v23  ;;  %v323_v27 = vrot.slane %v315_v23, %v314_v8  ;;  %v373_v28 = vcombine.high %v372_v24, %v372_v24  ;;  %v380_v29 = vrot.slane %v372_v24, %v314_v8 }
  0xfd   : > { %v429_v30 = vcombine.high %v428_v25, %v428_v25  ;;  %v436_v31 = vrot.slane %v428_v25, %v314_v8  ;;  %v486_v32 = vcombine.high %v485_v22, %v485_v22  ;;  %v493_v33 = vrot.slane %v485_v22, %v314_v8 }
  0xfe   : > { %v330_v34 = vrot.slane %v316_v26, %v314_v8  ;;  %v331_v35 = vcombine.high %v323_v27, %v323_v27  ;;  %338 = vst.msk [vmem:[%s1073_s13] sm:$0x1] %vm337_vm4, %v323_v27  ;;  %v387_v36 = vrot.slane %v373_v28, %v314_v8  ;;  %v388_v37 = vcombine.high %v380_v29, %v380_v29 }
  0xff   : > { %394 = vst.msk [vmem:[%s1073_s13 + $0x1] sm:$0x1] %vm337_vm4, %v380_v29  ;;  %v443_v38 = vrot.slane %v429_v30, %v314_v8  ;;  %v444_v39 = vcombine.high %v436_v31, %v436_v31  ;;  %629 = vst.msk [vmem:[%s1073_s13 + $0x8] sm:$0x1] %vm337_vm4, %v436_v31  ;;  %v500_v40 = vrot.slane %v486_v32, %v314_v8 }
 0x100   : > { %v501_v41 = vcombine.high %v493_v33, %v493_v33  ;;  %633 = vst.msk [vmem:[%s1073_s13 + $0x9] sm:$0x1] %vm337_vm4, %v493_v33  ;;  %v332_v42 = vcombine.high %v330_v34, %v330_v34  ;;  %339 = vst.msk [vmem:[%s1073_s13 + $0x2] sm:$0x1] %vm337_vm4, %v330_v34  ;;  %v389_v43 = vcombine.high %v387_v36, %v387_v36 }
 0x101   : > { %340 = vst.msk [vmem:[%s1073_s13 + $0x4] sm:$0x1] %vm337_vm4, %v331_v35  ;;  %395 = vst.msk [vmem:[%s1073_s13 + $0x3] sm:$0x1] %vm337_vm4, %v387_v36  ;;  %v445_v44 = vcombine.high %v443_v38, %v443_v38  ;;  %v502_v45 = vcombine.high %v500_v40, %v500_v40 }
 0x102   : > { %396 = vst.msk [vmem:[%s1073_s13 + $0x5] sm:$0x1] %vm337_vm4, %v388_v37  ;;  %630 = vst.msk [vmem:[%s1073_s13 + $0xa] sm:$0x1] %vm337_vm4, %v443_v38 }
 0x103   : > { %631 = vst.msk [vmem:[%s1073_s13 + $0xc] sm:$0x1] %vm337_vm4, %v444_v39  ;;  %634 = vst.msk [vmem:[%s1073_s13 + $0xb] sm:$0x1] %vm337_vm4, %v500_v40 }
 0x104   : > { %635 = vst.msk [vmem:[%s1073_s13 + $0xd] sm:$0x1] %vm337_vm4, %v501_v41  ;;  %341 = vst.msk [vmem:[%s1073_s13 + $0x6] sm:$0x1] %vm337_vm4, %v332_v42 }
 0x105   : > { %397 = vst.msk [vmem:[%s1073_s13 + $0x7] sm:$0x1] %vm337_vm4, %v389_v43  ;;  %632 = vst.msk [vmem:[%s1073_s13 + $0xe] sm:$0x1] %vm337_vm4, %v445_v44 }
 0x106   : > { %636 = vst.msk [vmem:[%s1073_s13 + $0xf] sm:$0x1] %vm337_vm4, %v502_v45 }
 0x107   : > { %788 = shalt.err (!%p785_p4)
}
 0x108   : > { %s789_s17 = scalar_lea.hbm %s1095_s24, 256  ;;  %s793_s23 = scalar_lea.hbm %s1169_s2, 2048 }
 0x109   : > { %p790_p3 = scmp.ne.s32.totalorder %s1095_s24, %s789_s17  ;;  %p794_p2 = scmp.lt.u32.totalorder %s1095_s24, %s1169_s2 }
 0x10a   : > { %p795_p5 = scmp.lt.u32.totalorder %s793_s23, %s789_s17  ;;  %p797_p8 = scmp.lt.u32.totalorder %s789_s17, %s1095_s24 }
 0x10b   : > { %p791_p6 = pnand %p790_p3, %p1176_p9 }
 0x10c   : > { %p796_p10 = por %p795_p5, %p794_p2 }
 0x10d   : > { %p792_p7 = pneg %p791_p6 }
 0x10e   : > { %p798_p12 = por %p797_p8, %p796_p10 }
 0x110   : > { %p799_p0 = pnand %p798_p12, %p792_p7 }
 0x112   : > { %802 = shalt.err (!%p799_p0)
}
 0x113   : > { %s885_s13 = smov 32   ;;  %s886_s5 = smov 2  }
 0x114   : > { %645 = dma.vmem_to_hbm [thread:$0]  (%p1176_p9), %s1097_s6, 256, %s1095_s24, %s512_s7, %s885_s13, %s885_s13, %s886_s5  }
 0x115 PF: > { %p656_p11 = scmp.ge.s32.totalorder %s873_s16, 2  ;;  %s542_s29 = sand.u32 1, %s845_s9  }
 0x116   : > { %p1177_p13 = scmp.ne.s32.totalorder %s1174_s28, 0  ;;  %s543_s22 = scalar_lea.sflag [#allocation5], %s542_s29 }
 0x118   : > { %p652_p1 = pnand %p656_p11, %p1177_p13 }
 0x11a   : > { %840 = dma.done.wait (!%p652_p1), %s543_s22, 256  }
 0x11b   : > { %842 = vsyncadd (!%p652_p1), %s543_s22, 4294967040  ;;  %s18_s16 = sadd.s32 1, %s873_s16   ;;  %s1178_s9 = smov %s849_s10 }
 0x11c   : > { %p15_p4 = scmp.ge.s32.totalorder %s18_s16, 10   ;;  %s1179_s10 = smov %s853_s11 }
 0x11d   : > { %s1180_s11 = smov %s980_s30  ;;  %s1181_s12 = smov %s865_s14 }
 0x11e   : > { %s1182_s13 = smov %s869_s15  ;;  %s1183_s14 = smov %s1186_s19 }
 0x11f   : > { %s1184_s15 = smov %s1190_s20  ;;  %17 = sbr.rel (!%p15_p4) target bundleno = 7 (0x7), region = 80 }
 0x126   :  { %548 = vsyncpa [#allocation4], 1 }
 0x127   :  { %550 = vsyncpa [#allocation4 + $0x1], 1 }
 0x128   :  { %551 = vsyncpa [#allocation5], 1 }
 0x129   :  { %553 = vsyncpa [#allocation5 + $0x1], 1 }

</bundles_post_ra>
